<compile_context>
chip_gen: v5e
topology: v5e:2x2
jax: 0.10.0
libtpu: 0.0.40
codegen_flags: <defaults>
</compile_context>

<pallas_src>
import functools

import jax
import jax.numpy as jnp
import numpy as np
from jax.experimental import pallas as pl
from jax.experimental.pallas import tpu as pltpu


# ----------------------------------------------------------------------------
# Fused kernel: polyphase ConvTranspose2d with BN affine + bias folded into the
# weights.  One MXU matmul produces all stride*stride output phases for every image
# in this lane tile at once; output is a lane-dense (P*Cout, L) slab.
# ----------------------------------------------------------------------------
def _fused_convt_kernel(x_ref, extras_ref, w_ref, o_ref, *, L, shift_offsets):
    x = x_ref[...]                                     # (Cin, L) raw activations
    views = []
    for si, k in enumerate(shift_offsets):
        if k == 0:
            views.append(x)                            # shift (0,0): no roll, mask == 1
        else:
            # x[:, p + k] via an XLU lane rotation; every wrapped lane is zeroed by the
            # precomputed per-shift validity mask (see NOTE in the wrapper).
            v = pltpu.roll(x, shift=L - k, axis=1)
            views.append(v * extras_ref[si:si + 1, :])
    # Shifted views + (mask, ones) extra contraction rows carrying the folded BN shift
    # and conv bias -> one deep contraction, one MXU matmul, no per-pixel VPU affine.
    x4 = jnp.concatenate(views + [extras_ref[...]], axis=0)     # (S*Cin + S + 1, L)
    acc = jnp.dot(w_ref[...], x4.astype(w_ref.dtype),
                  preferred_element_type=jnp.float32)           # (P*Cout, L)
    o_ref[...] = jnp.maximum(acc, 0.0).astype(o_ref.dtype)


# ----------------------------------------------------------------------------
# Static polyphase decomposition of ConvTranspose2d(K, stride, padding, output_padding)
# into taps on the un-upsampled input.
# ----------------------------------------------------------------------------
def _polyphase_decompose(K, stride, pad, opad, H, W):
    lpad = K - 1 - pad
    Ho = (H - 1) * stride - 2 * pad + K + opad
    Wo = (W - 1) * stride - 2 * pad + K + opad
    if Ho != stride * H or Wo != stride * W:
        # TODO(synk): only the standard up-sampling geometry (Ho == stride*H) is implemented.
        raise NotImplementedError("polyphase path assumes Ho == stride*H, Wo == stride*W")
    taps_per_phase = []
    shift_set = set()
    for ro in range(stride):
        for cc in range(stride):
            taps = []
            for kh in range(K):
                t = ro + kh - lpad
                if t % stride:
                    continue
                dr = t // stride
                for kw in range(K):
                    u = cc + kw - lpad
                    if u % stride:
                        continue
                    dc = u // stride
                    if dr < 0 or dc < 0 or dr >= H or dc >= W:
                        raise NotImplementedError("unsupported conv-transpose geometry")
                    taps.append((kh, kw, dr, dc))
                    shift_set.add((dr, dc))
            taps_per_phase.append(taps)
    return tuple(sorted(shift_set)), taps_per_phase


def _default_lane_tiles():
    # v7x has 2 TensorCores per chip ("parallel" grid axes shard across them);
    # v5e/v6e have one TC, where extra grid steps are pure serial-loop overhead.
    try:
        kind = jax.devices()[0].device_kind.lower()
    except Exception:
        return 1
    return 2 if "v7" in kind else 1


# ----------------------------------------------------------------------------
# Wrapper: full ConvTransposeBlock forward (NCHW in, NCHW out).
# ----------------------------------------------------------------------------
@functools.partial(jax.jit, static_argnums=(5, 6, 7, 8, 9, 10))
def conv_transpose_block(x_nchw, gamma, beta, w_pt, b_pt, K, stride, pad, opad,
                         lane_tiles=1, compute_dtype=jnp.float32):
    N, Cin, H, W = x_nchw.shape
    Cout = w_pt.shape[1]
    HW = H * W
    L_all = N * HW
    eps = 1e-5

    x_nchw = x_nchw.astype(jnp.float32)

    # --- BatchNorm2d batch statistics (training mode): tiny two-pass jnp reduction in
    # the wrapper; fuses with the scale/shift math, no separate kernel launch. ---
    mean = jnp.mean(x_nchw, axis=(0, 2, 3))
    var = jnp.mean((x_nchw - mean[None, :, None, None]) ** 2, axis=(0, 2, 3))  # biased
    scale = gamma.astype(jnp.float32) / jnp.sqrt(var + eps)
    shift = beta.astype(jnp.float32) - mean * scale

    # --- Static polyphase decomposition ---
    shifts, taps_per_phase = _polyphase_decompose(K, stride, pad, opad, H, W)
    P_, S_ = stride * stride, len(shifts)
    shift_idx = {sh: i for i, sh in enumerate(shifts)}
    shift_offsets = tuple(dr * W + dc for (dr, dc) in shifts)

    # Static tap tensor T[p, s, kh, kw]: which flipped-kernel taps feed output phase p
    # through input shift s.
    T = np.zeros((P_, S_, K, K), np.float32)
    for p, taps in enumerate(taps_per_phase):
        for (kh, kw, dr, dc) in taps:
            T[p, shift_idx[(dr, dc)], kh, kw] = 1.0

    # Base polyphase weight W0[p, o, s, c]; fold the BN scale into its columns and build
    # the extra contraction columns carrying the BN shift (per-shift mask rows) and the
    # conv bias (all-ones row).
    wf = w_pt.astype(jnp.float32)[:, :, ::-1, ::-1]              # (Cin, Cout, K, K) flipped
    W0 = jnp.einsum('pshw,cohw->posc', jnp.asarray(T), wf)       # (P, Cout, S, Cin)
    w_main = (W0 * scale[None, None, None, :]).reshape(P_ * Cout, S_ * Cin)
    w_shift = jnp.einsum('posc,c->pos', W0, shift).reshape(P_ * Cout, S_)
    w_bias = jnp.tile(b_pt.astype(jnp.float32), P_)[:, None]     # row p*Cout+o -> b[o]
    w_all = jnp.concatenate([w_main, w_shift, w_bias], axis=1).astype(compute_dtype)

    # Per-shift validity masks (tiled over the batch, which lives in the lane axis) plus
    # an all-ones row for the bias.
    #
    # NOTE: the in-kernel pltpu.roll wraps around the lane axis; every wrapped lane is a
    # pixel with r+dr >= H or c+dc >= W (or a cross-image position), all of which are
    # zeroed by these masks.  This relies on dr, dc >= 0 and Ho == stride*H, both
    # guarded by NotImplementedError in _polyphase_decompose.
    extras_np = np.zeros((S_ + 1, L_all), np.float32)
    for si, (dr, dc) in enumerate(shifts):
        m = np.zeros((H, W), np.float32)
        m[:H - dr, :W - dc] = 1.0
        extras_np[si] = np.tile(m.reshape(HW), N)
    extras_np[S_] = 1.0
    extras = jnp.asarray(extras_np)

    # Batch folded into lanes: (Cin, N*H*W) slab, column index = n*HW + r*W + c.
    x_lane = jnp.transpose(x_nchw, (1, 0, 2, 3)).reshape(Cin, L_all)
    # TODO(synk): at larger sizes also cast x_lane/extras to bf16 (halves HBM/VMEM
    # traffic on v6e/v7x); kept f32 here since the toy problem is launch-overhead bound.

    # Lane tiling: 1 tile (single grid step) for single-TC v5e/v6e; 2 "parallel" tiles
    # for dual-TC v7x.  Tiles must cover whole images (roll/mask correctness) and be
    # multiples of 128 lanes (unmasked stores); otherwise fall back to a single tile.
    if (lane_tiles < 1 or L_all % lane_tiles or (L_all // lane_tiles) % HW
            or (L_all // lane_tiles) % 128):
        lane_tiles = 1
    L_tile = L_all // lane_tiles
    Kdim = S_ * Cin + S_ + 1

    kern = functools.partial(_fused_convt_kernel, L=L_tile, shift_offsets=shift_offsets)
    out_slab = pl.pallas_call(
        kern,
        out_shape=jax.ShapeDtypeStruct((P_ * Cout, L_all), jnp.float32),
        grid=(lane_tiles,),
        in_specs=[pl.BlockSpec((Cin, L_tile), lambda t: (0, t)),
                  pl.BlockSpec((S_ + 1, L_tile), lambda t: (0, t)),
                  pl.BlockSpec((P_ * Cout, Kdim), lambda t: (0, 0))],
        out_specs=pl.BlockSpec((P_ * Cout, L_tile), lambda t: (0, t)),
        compiler_params=pltpu.CompilerParams(dimension_semantics=("parallel",)),
    )(x_lane, extras, w_all)

    # Phase de-interleave -> NCHW (single fused XLA transpose; layout plumbing only).
    out = out_slab.reshape(stride, stride, Cout, N, H, W)
    out = jnp.transpose(out, (3, 2, 4, 0, 5, 1))                 # (N, Cout, H, ro, W, co)
    return out.reshape(N, Cout, stride * H, stride * W)


# ----------------------------------------------------------------------------
# Independent pure-JAX reference (lax.conv_general_dilated) for validation.
# ----------------------------------------------------------------------------
def reference(x_nchw, gamma, beta, w_pt, b_pt, K, stride, pad, opad):
    eps = 1e-5
    mean = jnp.mean(x_nchw, axis=(0, 2, 3))
    var = jnp.var(x_nchw, axis=(0, 2, 3))                # biased
    xb = (x_nchw - mean[None, :, None, None]) / jnp.sqrt(var + eps)[None, :, None, None]
    xb = xb * gamma[None, :, None, None] + beta[None, :, None, None]
    w_flip = w_pt[:, :, ::-1, ::-1]
    w_oihw = jnp.transpose(w_flip, (1, 0, 2, 3))
    lp, rp = K - 1 - pad, K - 1 - pad + opad
    y = jax.lax.conv_general_dilated(
        xb, w_oihw, window_strides=(1, 1),
        padding=((lp, rp), (lp, rp)),
        lhs_dilation=(stride, stride),
        dimension_numbers=('NCHW', 'OIHW', 'NCHW'))
    y = y + b_pt[None, :, None, None]
    return jnp.maximum(y, 0.0)


if __name__ == "__main__":
    key = jax.random.PRNGKey(0)
    N, Cin, H, W = 2, 4, 16, 16
    Cout, K, stride, pad, opad = 8, 3, 2, 1, 1

    k1, k2, k3, k4, k5 = jax.random.split(key, 5)
    x = jax.random.normal(k1, (N, Cin, H, W), jnp.float32)
    # Deterministic synthetic parameters (shapes follow nn.BatchNorm2d / nn.ConvTranspose2d)
    gamma = jax.random.uniform(k2, (Cin,), jnp.float32, 0.5, 1.5)
    beta = 0.1 * jax.random.normal(k3, (Cin,), jnp.float32)
    bound = 1.0 / np.sqrt(Cin * K * K)
    w_pt = jax.random.uniform(k4, (Cin, Cout, K, K), jnp.float32, -bound, bound)
    b_pt = jax.random.uniform(k5, (Cout,), jnp.float32, -bound, bound)

    lane_tiles = _default_lane_tiles()

    # f32 path (faithful to the PyTorch module's numerics).
    out = conv_transpose_block(x, gamma, beta, w_pt, b_pt, K, stride, pad, opad,
                               lane_tiles, jnp.float32)
    out = jax.block_until_ready(out)

    Ho = (H - 1) * stride - 2 * pad + K + opad
    assert out.shape == (N, Cout, Ho, Ho), out.shape

    ref = reference(x, gamma, beta, w_pt, b_pt, K, stride, pad, opad)
    np.testing.assert_allclose(np.asarray(out), np.asarray(ref), rtol=1e-4, atol=1e-4)

    # bf16 MXU-operand path (what you'd run at scale on v6e/v7x); loose tolerance.
    out_bf16 = conv_transpose_block(x, gamma, beta, w_pt, b_pt, K, stride, pad, opad,
                                    lane_tiles, jnp.bfloat16)
    out_bf16 = jax.block_until_ready(out_bf16)
    np.testing.assert_allclose(np.asarray(out_bf16), np.asarray(ref), rtol=5e-2, atol=5e-2)

    print("KERNEL_OK")
</pallas_src>

<mosaic_0001>
module attributes {stable_mosaic.version = 11 : i64} {
  func.func @_fused_convt_kernel(%arg0: i32, %arg1: memref<4x512xf32, #tpu.memory_space<vmem>>, %arg2: memref<5x512xf32, #tpu.memory_space<vmem>>, %arg3: memref<32x21xf32, #tpu.memory_space<vmem>>, %arg4: memref<32x512xf32, #tpu.memory_space<vmem>>) attributes {dimension_semantics = [#tpu.dimension_semantics<parallel>], iteration_bounds = array<i64: 1>, scalar_prefetch = 0 : i64, scratch_operands = 0 : i64, tpu.core_type = #tpu.core_type<tc>, window_params = [{transform_indices = @transform_0, window_bounds = array<i64: 4, 512>}, {transform_indices = @transform_1, window_bounds = array<i64: 5, 512>}, {pipeline_mode = #tpu.pipeline_mode<synchronous>, transform_indices = @transform_2, window_bounds = array<i64: 32, 21>}, {transform_indices = @transform_3, window_bounds = array<i64: 32, 512>}]} {
    %c0 = arith.constant 0 : index
    %c0_0 = arith.constant 0 : index
    %0 = vector.load %arg1[%c0, %c0_0] : memref<4x512xf32, #tpu.memory_space<vmem>>, vector<4x512xf32>
    %c511_i32 = arith.constant 511 : i32
    %1 = tpu.dynamic_rotate %0 by %c511_i32 dim 1 : vector<4x512xf32>, i32 -> vector<4x512xf32>
    %c1 = arith.constant 1 : index
    %c0_1 = arith.constant 0 : index
    %2 = vector.load %arg2[%c1, %c0_1] : memref<5x512xf32, #tpu.memory_space<vmem>>, vector<1x512xf32>
    %3 = vector.broadcast %2 : vector<1x512xf32> to vector<4x512xf32>
    %4 = arith.mulf %1, %3 : vector<4x512xf32>
    %c496_i32 = arith.constant 496 : i32
    %5 = tpu.dynamic_rotate %0 by %c496_i32 dim 1 : vector<4x512xf32>, i32 -> vector<4x512xf32>
    %c2 = arith.constant 2 : index
    %c0_2 = arith.constant 0 : index
    %6 = vector.load %arg2[%c2, %c0_2] : memref<5x512xf32, #tpu.memory_space<vmem>>, vector<1x512xf32>
    %7 = vector.broadcast %6 : vector<1x512xf32> to vector<4x512xf32>
    %8 = arith.mulf %5, %7 : vector<4x512xf32>
    %c495_i32 = arith.constant 495 : i32
    %9 = tpu.dynamic_rotate %0 by %c495_i32 dim 1 : vector<4x512xf32>, i32 -> vector<4x512xf32>
    %c3 = arith.constant 3 : index
    %c0_3 = arith.constant 0 : index
    %10 = vector.load %arg2[%c3, %c0_3] : memref<5x512xf32, #tpu.memory_space<vmem>>, vector<1x512xf32>
    %11 = vector.broadcast %10 : vector<1x512xf32> to vector<4x512xf32>
    %12 = arith.mulf %9, %11 : vector<4x512xf32>
    %c0_4 = arith.constant 0 : index
    %c0_5 = arith.constant 0 : index
    %13 = vector.load %arg2[%c0_4, %c0_5] : memref<5x512xf32, #tpu.memory_space<vmem>>, vector<5x512xf32>
    %14 = tpu.concatenate %0, %4, %8, %12, %13 in 0 : vector<4x512xf32>, vector<4x512xf32>, vector<4x512xf32>, vector<4x512xf32>, vector<5x512xf32> -> vector<21x512xf32>
    %c0_6 = arith.constant 0 : index
    %c0_7 = arith.constant 0 : index
    %15 = vector.load %arg3[%c0_6, %c0_7] : memref<32x21xf32, #tpu.memory_space<vmem>>, vector<32x21xf32>
    %cst = arith.constant dense<0.000000e+00> : vector<32x512xf32>
    %16 = tpu.matmul %15, %14, %cst {dimension_numbers = #tpu.dot_dimension_numbers<[1], [0], [0], [1], [0, 0, 1, 1], [], []>} : vector<32x21xf32>, vector<21x512xf32>, vector<32x512xf32> -> vector<32x512xf32>
    %cst_8 = arith.constant 0.000000e+00 : f32
    %17 = vector.broadcast %cst_8 : f32 to vector<32x512xf32>
    %18 = arith.maximumf %16, %17 : vector<32x512xf32>
    %c0_9 = arith.constant 0 : index
    %c0_10 = arith.constant 0 : index
    %19 = vector.load %arg4[%c0_9, %c0_10] : memref<32x512xf32, #tpu.memory_space<vmem>>, vector<32x512xf32>
    tpu.vector_store %arg4[%c0_9, %c0_10], %18 {strides = array<i32>} : memref<32x512xf32, #tpu.memory_space<vmem>>, vector<32x512xf32>,
    return
  }
  func.func @transform_0(%arg0: i32) -> (i32, i32) {
    %c0_i32 = arith.constant 0 : i32
    %c0_i32_0 = arith.constant 0 : i32
    return %c0_i32, %arg0 : i32, i32
  }
  func.func @transform_1(%arg0: i32) -> (i32, i32) {
    %c0_i32 = arith.constant 0 : i32
    %c0_i32_0 = arith.constant 0 : i32
    return %c0_i32, %arg0 : i32, i32
  }
  func.func @transform_2(%arg0: i32) -> (i32, i32) {
    %c0_i32 = arith.constant 0 : i32
    %c0_i32_0 = arith.constant 0 : i32
    %c0_i32_1 = arith.constant 0 : i32
    return %c0_i32, %c0_i32_0 : i32, i32
  }
  func.func @transform_3(%arg0: i32) -> (i32, i32) {
    %c0_i32 = arith.constant 0 : i32
    %c0_i32_0 = arith.constant 0 : i32
    return %c0_i32, %arg0 : i32, i32
  }
}

</mosaic_0001>

<bundles_post_ra>
// kernel: tile.8
= control target key start
LH: loop header
LB: loop body
LE: loop exit
PB: predicated region body
PF: predicated region fallthrough
CT: control target
= control target key end

     0   :  { %s22_s0 = inlined_call_operand.vmem [shape: f32[8], index: 0, kind: input, shape index: {}]   ;;  %s23_s1 = inlined_call_operand.vmem [shape: f32[4,8], index: 1, kind: output, shape index: {}]  }
   0x1   :  { %v4_v0 = vld [vmem:[%s22_s0] ss:$0 sm:$0xff] }
   0x2   :  { %5 = vst [vmem:[%s23_s1] sm:$0xf] %v4_v0 }

// kernel: tile.0
= control target key start
LH: loop header
LB: loop body
LE: loop exit
PB: predicated region body
PF: predicated region fallthrough
CT: control target
= control target key end

     0   :  { %s66_s8 = smov 125   ;;  %s67_s9 = smov 123   ;;  %vm7_vm0 = vcmask 7168   ;;  %s117_s0 = inlined_call_operand.vmem [shape: f32[4,8], index: 0, kind: input, shape index: {}]   ;;  %s118_s1 = inlined_call_operand.vmem [shape: f32[32,1], index: 1, kind: output, shape index: {}]  }
   0x1   :  { %v4_v0 = vld [vmem:[%s117_s0] sm:$0xf]  ;;  %s65_s0 = smov 127   ;;  %s68_s10 = smov 126  }
   0x2   :  { %5 = vst [vmem:[#allocation0] sm:$0xf] %v4_v0  ;;  %s69_s11 = smov 124   ;;  %s70_s12 = smov 122  }
   0x3   :  { %s71_s13 = smov 121  }
   0x9   :  { %v9_v1 = vld [vmem:[#allocation0] sm:$0xf]  }
   0xa   :  { %v21_v2 = vld [vmem:[#allocation0] sm:$0xf]   ;;  %10 = vrot.lane.b32.xlu0 %v9_v1, %s65_s0 }
   0xb   :  { %22 = vrot.lane.b32.xlu1 %v21_v2, %s66_s8  ;;  %v33_v3 = vld [vmem:[#allocation0] sm:$0xf]  }
   0xc   :  { %34 = vrot.lane.b32.xlu2 %v33_v3, %s67_s9  ;;  %v15_v4 = vld [vmem:[#allocation0] sm:$0xf]  }
   0xd   :  { %v27_v5 = vld [vmem:[#allocation0] sm:$0xf]  }
   0xe   :  { %v39_v6 = vld [vmem:[#allocation0] sm:$0xf]  }
   0xf   :  { %v45_v7 = vld [vmem:[#allocation0] sm:$0xf]  }
  0x10   :  { %v6_v8 = vld [vmem:[#allocation0] sm:$0xf]  }
  0x11   :  { %8 = vst.msk [vmem:[%s118_s1] ss:$8 sm:$0xf] %vm7_vm0, %v6_v8  }
  0x12   :  { %16 = vrot.lane.b32.xlu0 %v15_v4, %s68_s10 }
  0x13   :  { %28 = vrot.lane.b32.xlu1 %v27_v5, %s69_s11 }
  0x14   :  { %40 = vrot.lane.b32.xlu2 %v39_v6, %s70_s12 }
  0x1a   :  { %46 = vrot.lane.b32.xlu0 %v45_v7, %s71_s13 }
  0x66   :  { %v35_v9 = vpop.permute.xlu2 %34  }
  0x67   :  { %55 = vst.msk [vmem:[%s118_s1 + $0x5] ss:$8 sm:$0xf] %vm7_vm0, %v35_v9  }
  0x6e   :  { %v41_v10 = vpop.permute.xlu2 %40  }
  0x6f   :  { %56 = vst.msk [vmem:[%s118_s1 + $0x6] ss:$8 sm:$0xf] %vm7_vm0, %v41_v10  }
  0x7c   :  { %v11_v11 = vpop.permute.xlu0 %10  }
  0x7d   :  { %v23_v12 = vpop.permute.xlu1 %22   ;;  %51 = vst.msk [vmem:[%s118_s1 + $0x1] ss:$8 sm:$0xf] %vm7_vm0, %v11_v11  }
  0x7e   :  { %53 = vst.msk [vmem:[%s118_s1 + $0x3] ss:$8 sm:$0xf] %vm7_vm0, %v23_v12  }
  0x84   :  { %v17_v13 = vpop.permute.xlu0 %16  }
  0x85   :  { %v29_v14 = vpop.permute.xlu1 %28   ;;  %52 = vst.msk [vmem:[%s118_s1 + $0x2] ss:$8 sm:$0xf] %vm7_vm0, %v17_v13  }
  0x86   :  { %54 = vst.msk [vmem:[%s118_s1 + $0x4] ss:$8 sm:$0xf] %vm7_vm0, %v29_v14  }
  0x8c   :  { %v47_v15 = vpop.permute.xlu0 %46  }
  0x8d   :  { %57 = vst.msk [vmem:[%s118_s1 + $0x7] ss:$8 sm:$0xf] %vm7_vm0, %v47_v15  }

// kernel: conv_transpose_block.1
= control target key start
LH: loop header
LB: loop body
LE: loop exit
PB: predicated region body
PF: predicated region fallthrough
CT: control target
= control target key end

     0   :  { %s393_s16 = smov 127   ;;  %s394_s17 = smov 112   ;;  %vm202_vm0 = vcmask 1044480   ;;  %v37_v20 = vlaneseq  ;;  %vm176_vm4 = vcmask 1043456   ;;  %vm189_vm5 = vcmask 171008   ;;  %s568_s0 = inlined_call_operand.vmem [shape: f32[4,512], index: 0, kind: input, shape index: {}]   ;;  %s569_s1 = inlined_call_operand.vmem [shape: f32[5,512], index: 1, kind: input, shape index: {}]   ;;  %s570_s2 = inlined_call_operand.vmem [shape: f32[32,21], index: 2, kind: input, shape index: {}]   ;;  %s571_s3 = inlined_call_operand.vmem [shape: f32[32,512], index: 3, kind: output, shape index: {}]  }
   0x1   :  { %v14_v0 = vld [vmem:[%s568_s0] sm:$0xff]  ;;  %v15_v1 = vld [vmem:[%s568_s0 + $0x8] sm:$0xff]  ;;  %s395_s0 = smov 111   ;;  %v140_v14 = vld [vmem:[%s569_s1 + $0x18] sm:$0x1f] }
   0x2   :  { %18 = vst [vmem:[#allocation1] ss:$2 sm:$0xff] %v14_v0  ;;  %385 = vmatpush.msk.msra.mxu3 %vm202_vm0, %v140_v14  ;;  %v139_v16 = vld [vmem:[%s569_s1 + $0x10] sm:$0x1f]  ;;  %v137_v18 = vld [vmem:[%s569_s1] sm:$0x1f] }
   0x3   :  { %20 = vst [vmem:[#allocation1 + $0x10] ss:$2 sm:$0xff] %v15_v1  ;;  %380 = vmatpush.msk.msra.mxu2 %vm202_vm0, %v139_v16  ;;  %370 = vmatpush.msk.msra.mxu0 %vm202_vm0, %v137_v18  ;;  %v138_v19 = vld [vmem:[%s569_s1 + $0x8] sm:$0x1f]  ;;  %v434_v23 = vand.u32 127, %v37_v20  ;;  %v185_v52 = vld [vmem:[%s570_s2] sm:$0xff] }
   0x4   :  { %375 = vmatpush.msk.msra.mxu1 %vm202_vm0, %v138_v19  ;;  %v367_v25 = vld [vmem:[%s569_s1 + $0x1] ss:$8 sm:$0xf]  ;;  %v443_v26 = vld [vmem:[%s569_s1 + $0x3] ss:$8 sm:$0xf] }
   0x5   :  { %vm39_vm1 = vcmp.lt.s32.totalorder %v434_v23, 127  ;;  %v50_v27 = vperm.slane %v367_v25, 3  ;;  %v450_v29 = vld [vmem:[%s569_s1 + $0x2] ss:$8 sm:$0xf]  ;;  %vm78_vm2 = vcmp.lt.s32.totalorder %v434_v23, 112 }
   0x6   :  { %vm117_vm3 = vcmp.lt.s32.totalorder %v434_v23, 111  ;;  %v128_v30 = vperm.slane %v443_v26, 3  ;;  %v89_v34 = vperm.slane %v450_v29, 3  ;;  %v49_v36 = vperm.slane %v367_v25, 2  ;;  %v186_v14 = vld [vmem:[%s570_s2 + $0x8] sm:$0xff] }
   0x7   :  { %v127_v44 = vperm.slane %v443_v26, 2  ;;  %v88_v47 = vperm.slane %v450_v29, 2  ;;  %v47_v58 = vperm.slane %v367_v25, 0  ;;  %v48_v59 = vperm.slane %v367_v25, 1 }
   0x9   :  { %v21_v2 = vld.sshfl [vmem:[#allocation1] sm:$0xff pattern:$0x75316420]  ;;  %v22_v3 = vld.sshfl [vmem:[#allocation1 + $0x8] sm:$0xff pattern:$0x75316420] }
   0xa   :  { %29 = vrot.lane.b32.xlu1 %v21_v2, %s393_s16  ;;  %59 = vst [vmem:[#allocation1] ss:$2 sm:$0xff] %v14_v0  ;;  %v23_v4 = vld.sshfl [vmem:[#allocation1 + $0x10] sm:$0xff pattern:$0x75316420]  ;;  %v125_v2 = vperm.slane %v443_v26, 0 }
   0xb   :  { %v24_v5 = vld.sshfl [vmem:[#allocation1 + $0x18] sm:$0xff pattern:$0x75316420]  ;;  %33 = vrot.lane.b32.xlu2 %v23_v4, %s393_s16  ;;  %v87_v4 = vperm.slane %v450_v29, 1 }
   0xc   :  { %61 = vst [vmem:[#allocation1 + $0x10] ss:$2 sm:$0xff] %v15_v1 }
  0x11   :  { %v62_v6 = vld.sshfl [vmem:[#allocation1] sm:$0xff pattern:$0x75316420]  ;;  %v63_v7 = vld.sshfl [vmem:[#allocation1 + $0x8] sm:$0xff pattern:$0x75316420] }
  0x12   :  { %70 = vrot.lane.b32.xlu0 %v62_v6, %s394_s17  ;;  %98 = vst [vmem:[#allocation1] ss:$2 sm:$0xff] %v14_v0 }
  0x13   :  { %v64_v8 = vld.sshfl [vmem:[#allocation1 + $0x10] sm:$0xff pattern:$0x75316420]  ;;  %v65_v9 = vld.sshfl [vmem:[#allocation1 + $0x18] sm:$0xff pattern:$0x75316420]  ;;  %35 = vrot.lane.b32.xlu2 %v24_v5, %s393_s16 }
  0x14   :  { %100 = vst [vmem:[#allocation1 + $0x10] ss:$2 sm:$0xff] %v15_v1  ;;  %74 = vrot.lane.b32.xlu1 %v64_v8, %s394_s17  ;;  %v86_v5 = vperm.slane %v450_v29, 0  ;;  %v187_v29 = vld [vmem:[%s570_s2 + $0x10] sm:$0xff] }
  0x19   :  { %v101_v10 = vld.sshfl [vmem:[#allocation1] sm:$0xff pattern:$0x75316420]  ;;  %v102_v11 = vld.sshfl [vmem:[#allocation1 + $0x8] sm:$0xff pattern:$0x75316420] }
  0x1a   :  { %109 = vrot.lane.b32.xlu0 %v101_v10, %s395_s0  ;;  %141 = vst [vmem:[#allocation1] ss:$2 sm:$0xff] %v14_v0 }
  0x1b   :  { %v104_v12 = vld.sshfl [vmem:[#allocation1 + $0x18] sm:$0xff pattern:$0x75316420]  ;;  %76 = vrot.lane.b32.xlu2 %v65_v9, %s394_s17  ;;  %v103_v13 = vld.sshfl [vmem:[#allocation1 + $0x10] sm:$0xff pattern:$0x75316420] }
  0x1c   :  { %115 = vrot.lane.b32.xlu1 %v104_v12, %s395_s0  ;;  %143 = vst [vmem:[#allocation1 + $0x10] ss:$2 sm:$0xff] %v15_v1 }
  0x21   :  { %v145_v23 = vld.sshfl [vmem:[#allocation1 + $0x8] sm:$0xff pattern:$0x75316420] }
  0x22   :  { %113 = vrot.lane.b32.xlu0 %v103_v13, %s395_s0 }
  0x23   :  { %72 = vrot.lane.b32.xlu2 %v63_v7, %s394_s17  ;;  %v147_v46 = vld.sshfl [vmem:[#allocation1 + $0x18] sm:$0xff pattern:$0x75316420]  ;;  %v146_v61 = vld.sshfl [vmem:[#allocation1 + $0x10] sm:$0xff pattern:$0x75316420] }
  0x24   :  { %31 = vrot.lane.b32.xlu1 %v22_v3, %s393_s16  ;;  %v126_v3 = vperm.slane %v443_v26, 1 }
  0x2a   :  { %111 = vrot.lane.b32.xlu0 %v102_v11, %s395_s0 }
  0x65   :  { %v34_v15 = vpop.permute.xlu2 %33 }
  0x6d   :  { %v36_v21 = vpop.permute.xlu2 %35 }
  0x6e   :  { %v40_v39 = vsel %vm39_vm1, %v34_v15, %v36_v21 }
  0x6f   :  { %v57_v45 = vmul.f32 %v49_v36, %v40_v39 }
  0x71   :  { %v158_v56 = vrot.slane %v57_v45, 4 }
  0x73   :  { %v179_v6 = vsel %vm176_vm4, %v146_v61, %v158_v56 }
  0x75   :  { %v77_v32 = vpop.permute.xlu2 %76 }
  0x7c   :  { %v30_v17 = vpop.permute.xlu1 %29 }
  0x7d   :  { %v43_v28 = vsel %vm39_vm1, %v36_v21, %v30_v17  ;;  %v73_v62 = vpop.permute.xlu2 %72 }
  0x7e   :  { %v58_v33 = vmul.f32 %v50_v27, %v43_v28 }
  0x80   :  { %v159_v41 = vrot.slane %v58_v33, 4 }
  0x82   :  { %v180_v55 = vsel %vm176_vm4, %v147_v46, %v159_v41 }
  0x84   :  { %v71_v22 = vpop.permute.xlu0 %70 }
  0x85   :  { %v82_v37 = vsel %vm78_vm2, %v77_v32, %v71_v22  ;;  %v81_v8 = vsel %vm78_vm2, %v71_v22, %v73_v62 }
  0x86   :  { %v75_v24 = vpop.permute.xlu1 %74  ;;  %v97_v42 = vmul.f32 %v89_v34, %v82_v37  ;;  %v94_v18 = vmul.f32 %v86_v5, %v81_v8 }
  0x87   :  { %v79_v50 = vsel %vm78_vm2, %v75_v24, %v77_v32  ;;  %v80_v7 = vsel %vm78_vm2, %v73_v62, %v75_v24  ;;  %v144_v24 = vld.sshfl [vmem:[#allocation1] sm:$0xff pattern:$0x75316420] }
  0x88   :  { %v96_v57 = vmul.f32 %v88_v47, %v79_v50 }
  0x8c   :  { %v110_v31 = vpop.permute.xlu0 %109 }
  0x8e   :  { %v116_v35 = vpop.permute.xlu1 %115 }
  0x8f   :  { %v121_v38 = vsel %vm117_vm3, %v116_v35, %v110_v31 }
  0x90   :  { %v136_v40 = vmul.f32 %v128_v30, %v121_v38  ;;  %v188_v30 = vld [vmem:[%s570_s2 + $0x18] sm:$0xff] }
  0x92   :  { %v171_v43 = vrot.slane %v136_v40, 4 }
  0x94   :  { %v184_v48 = vsel %vm176_vm4, %v97_v42, %v171_v43  ;;  %v114_v49 = vpop.permute.xlu0 %113 }
  0x95   :  { %316 = vmatpush.msra.mxu3 %v184_v48  ;;  %v118_v51 = vsel %vm117_vm3, %v114_v49, %v116_v35 }
  0x96   :  { %v32_v53 = vpop.permute.xlu1 %31  ;;  %v135_v54 = vmul.f32 %v127_v44, %v118_v51 }
  0x97   :  { %317 = vmatpush.msra.mxu3 %v180_v55  ;;  %v41_v63 = vsel %vm39_vm1, %v32_v53, %v34_v15  ;;  %v42_v0 = vsel %vm39_vm1, %v30_v17, %v32_v53  ;;  %v95_v17 = vmul.f32 %v87_v4, %v80_v7 }
  0x98   :  { %v170_v60 = vrot.slane %v135_v54, 4  ;;  %386 = vmatmul.msk.f32.vlgmr.msra.gmra.mxu3 %vm189_vm5, %v185_v52  ;;  %v55_v9 = vmul.f32 %v47_v58, %v42_v0  ;;  %v56_v10 = vmul.f32 %v48_v59, %v41_v63 }
  0x9a   :  { %v183_v1 = vsel %vm176_vm4, %v96_v57, %v170_v60  ;;  %v156_v19 = vrot.slane %v55_v9, 4  ;;  %v157_v20 = vrot.slane %v56_v10, 4 }
  0x9b   :  { %287 = vmatpush.msra.mxu2 %v183_v1 }
  0x9c   :  { %v112_v11 = vpop.permute.xlu0 %111  ;;  %v177_v27 = vsel %vm176_vm4, %v144_v24, %v156_v19  ;;  %v178_v28 = vsel %vm176_vm4, %v145_v23, %v157_v20 }
  0x9d   :  { %v119_v12 = vsel %vm117_vm3, %v112_v11, %v114_v49  ;;  %v120_v13 = vsel %vm117_vm3, %v110_v31, %v112_v11  ;;  %288 = vmatpush.msra.mxu2 %v179_v6 }
  0x9e   :  { %v133_v15 = vmul.f32 %v125_v2, %v120_v13  ;;  %v134_v16 = vmul.f32 %v126_v3, %v119_v12  ;;  %381 = vmatmul.msk.f32.vlgmr.msra.gmra.mxu2 %vm189_vm5, %v185_v52 }
  0xa0   :  { %v168_v21 = vrot.slane %v133_v15, 4  ;;  %v169_v22 = vrot.slane %v134_v16, 4  ;;  %387 = vmatmul.msk.f32.gmra.mxu3 %vm189_vm5, %v186_v14 }
  0xa2   :  { %v181_v25 = vsel %vm176_vm4, %v94_v18, %v168_v21  ;;  %v182_v26 = vsel %vm176_vm4, %v95_v17, %v169_v22 }
  0xa3   :  { %229 = vmatpush.msra.mxu0 %v181_v25  ;;  %258 = vmatpush.msra.mxu1 %v182_v26 }
  0xa5   :  { %230 = vmatpush.msra.mxu0 %v177_v27  ;;  %259 = vmatpush.msra.mxu1 %v178_v28 }
  0xa6   :  { %371 = vmatmul.msk.f32.vlgmr.msra.gmra.mxu0 %vm189_vm5, %v185_v52  ;;  %376 = vmatmul.msk.f32.vlgmr.msra.gmra.mxu1 %vm189_vm5, %v185_v52 }
  0xa7   :  { %382 = vmatmul.msk.f32.gmra.mxu2 %vm189_vm5, %v186_v14 }
  0xa8   :  { %388 = vmatmul.msk.f32.gmra.mxu3 %vm189_vm5, %v187_v29 }
  0xae   :  { %372 = vmatmul.msk.f32.gmra.mxu0 %vm189_vm5, %v186_v14  ;;  %377 = vmatmul.msk.f32.gmra.mxu1 %vm189_vm5, %v186_v14 }
  0xaf   :  { %383 = vmatmul.msk.f32.gmra.mxu2 %vm189_vm5, %v187_v29 }
  0xb0   :  { %389 = vmatmul.msk.f32.gmra.mxu3 %vm189_vm5, %v188_v30 }
  0xb6   :  { %373 = vmatmul.msk.f32.gmra.mxu0 %vm189_vm5, %v187_v29  ;;  %378 = vmatmul.msk.f32.gmra.mxu1 %vm189_vm5, %v187_v29 }
  0xb7   :  { %384 = vmatmul.msk.f32.gmra.mxu2 %vm189_vm5, %v188_v30 }
  0xbe   :  { %374 = vmatmul.msk.f32.gmra.mxu0 %vm189_vm5, %v188_v30  ;;  %379 = vmatmul.msk.f32.gmra.mxu1 %vm189_vm5, %v188_v30 }
 0x11b   :  { %v319_v31 = vpop.f32.mrf.mxu3 }
 0x11c   :  { %v334_v32 = vmax.f32 %v319_v31, 0.0 }
 0x11e   :  { %350 = vst [vmem:[%s571_s3 + $0x18] sm:$0xff] %v334_v32 }
 0x121   :  { %v290_v33 = vpop.f32.mrf.mxu2 }
 0x122   :  { %v333_v34 = vmax.f32 %v290_v33, 0.0 }
 0x123   :  { %v232_v35 = vpop.f32.mrf.mxu0  ;;  %v261_v36 = vpop.f32.mrf.mxu1 }
 0x124   :  { %v331_v37 = vmax.f32 %v232_v35, 0.0  ;;  %v332_v38 = vmax.f32 %v261_v36, 0.0  ;;  %349 = vst [vmem:[%s571_s3 + $0x10] sm:$0xff] %v333_v34  ;;  %v322_v39 = vpop.f32.mrf.mxu3 }
 0x125   :  { %v338_v40 = vmax.f32 %v322_v39, 0.0 }
 0x126   :  { %347 = vst [vmem:[%s571_s3] sm:$0xff] %v331_v37 }
 0x127   :  { %348 = vst [vmem:[%s571_s3 + $0x8] sm:$0xff] %v332_v38 }
 0x128   :  { %354 = vst [vmem:[%s571_s3 + $0x38] sm:$0xff] %v338_v40 }
 0x12a   :  { %v293_v41 = vpop.f32.mrf.mxu2 }
 0x12b   :  { %v235_v42 = vpop.f32.mrf.mxu0  ;;  %v264_v43 = vpop.f32.mrf.mxu1  ;;  %v337_v44 = vmax.f32 %v293_v41, 0.0 }
 0x12c   :  { %v335_v45 = vmax.f32 %v235_v42, 0.0  ;;  %v336_v46 = vmax.f32 %v264_v43, 0.0  ;;  %v325_v47 = vpop.f32.mrf.mxu3 }
 0x12d   :  { %353 = vst [vmem:[%s571_s3 + $0x30] sm:$0xff] %v337_v44  ;;  %v342_v48 = vmax.f32 %v325_v47, 0.0 }
 0x12e   :  { %351 = vst [vmem:[%s571_s3 + $0x20] sm:$0xff] %v335_v45 }
 0x12f   :  { %352 = vst [vmem:[%s571_s3 + $0x28] sm:$0xff] %v336_v46 }
 0x130   :  { %358 = vst [vmem:[%s571_s3 + $0x58] sm:$0xff] %v342_v48 }
 0x132   :  { %v296_v49 = vpop.f32.mrf.mxu2 }
 0x133   :  { %v238_v50 = vpop.f32.mrf.mxu0  ;;  %v267_v51 = vpop.f32.mrf.mxu1  ;;  %v341_v52 = vmax.f32 %v296_v49, 0.0 }
 0x134   :  { %v339_v53 = vmax.f32 %v238_v50, 0.0  ;;  %v340_v54 = vmax.f32 %v267_v51, 0.0  ;;  %v328_v55 = vpop.f32.mrf.mxu3 }
 0x135   :  { %357 = vst [vmem:[%s571_s3 + $0x50] sm:$0xff] %v341_v52  ;;  %v346_v56 = vmax.f32 %v328_v55, 0.0 }
 0x136   :  { %355 = vst [vmem:[%s571_s3 + $0x40] sm:$0xff] %v339_v53 }
 0x137   :  { %356 = vst [vmem:[%s571_s3 + $0x48] sm:$0xff] %v340_v54 }
 0x138   :  { %362 = vst [vmem:[%s571_s3 + $0x78] sm:$0xff] %v346_v56 }
 0x13a   :  { %v299_v57 = vpop.f32.mrf.mxu2 }
 0x13b   :  { %v241_v58 = vpop.f32.mrf.mxu0  ;;  %v270_v59 = vpop.f32.mrf.mxu1  ;;  %v345_v60 = vmax.f32 %v299_v57, 0.0 }
 0x13c   :  { %v343_v61 = vmax.f32 %v241_v58, 0.0  ;;  %v344_v62 = vmax.f32 %v270_v59, 0.0 }
 0x13d   :  { %361 = vst [vmem:[%s571_s3 + $0x70] sm:$0xff] %v345_v60 }
 0x13e   :  { %359 = vst [vmem:[%s571_s3 + $0x60] sm:$0xff] %v343_v61 }
 0x13f   :  { %360 = vst [vmem:[%s571_s3 + $0x68] sm:$0xff] %v344_v62 }

</bundles_post_ra>
